<compile_context>
chip_gen: v5e
topology: v5e:2x2
jax: 0.10.0
libtpu: 0.0.40
codegen_flags: <defaults>
</compile_context>

<pallas_src>
import jax
import jax.numpy as jnp
from jax.experimental import pallas as pl
from jax.experimental.pallas import tpu as pltpu


def residual_block(x_nchw, w1, b1, w2, b2):
    """x_nchw: (N, C, H, W); w*: (C, C, 3, 3) OIHW; b*: (C,). Returns (N, C, H, W)."""
    N, C, H, W = x_nchw.shape
    HW = H * W
    CP = ((C + 7) // 8) * 8                      # channels rounded to sublane tile
    HWP = ((HW + 127) // 128) * 128              # per-image lane footprint (aligned)
    LPAD = ((W + 1 + 127) // 128) * 128          # zero gap (>= W+1, 128-aligned)
    SPAN = HWP + LPAD                            # scratch stride per image
    dt = x_nchw.dtype
    itemsize = x_nchw.dtype.itemsize

    # ---- VMEM budget (v7x: 64 MiB per TensorCore, v5e/v6e: 128 MiB) ----
    try:
        vmem_cap = int(pltpu.get_tpu_info().vmem_capacity_bytes)
    except Exception:
        vmem_cap = 64 * 2**20                    # conservative, safe on all gens

    def step_bytes(nb):
        wtot = LPAD + nb * SPAN
        return ((2 + 2) * nb * C * HW * itemsize          # in/out blocks (double buffered)
                + 2 * 2 * C * 9 * CP * itemsize           # both weight slabs
                + CP * wtot * itemsize                    # padded flat-spatial scratch
                + 2 * 9 * CP * nb * HW * itemsize         # in-register im2col slabs
                + 2 * C * nb * HW * 4)                    # f32 conv results

    # Images per grid step: amortize per-step overhead, but keep >= 2 grid steps
    # when N >= 2 (one per TensorCore on v7x) and stay inside the VMEM budget.
    NB = 1
    if N >= 2:
        for cand in range(N // 2, 0, -1):
            if N % cand == 0 and step_bytes(cand) <= vmem_cap // 3:
                NB = cand
                break
    WTOT = LPAD + NB * SPAN

    # ---- wrapper-side prep (all free / tiny) ----
    xf = x_nchw.reshape(N, C, HW)                # free reshape, stays NCHW row-major

    def prep_w(w):                               # OIHW -> (Cout, 9*CP), tap-major K
        wt = jnp.transpose(w, (0, 2, 3, 1))      # (Cout, ky, kx, Cin)
        wt = jnp.pad(wt, ((0, 0), (0, 0), (0, 0), (0, CP - C)))
        return wt.reshape(C, 9 * CP).astype(dt)

    w1p, w2p = prep_w(w1), prep_w(w2)
    b1p = b1.reshape(C, 1).astype(jnp.float32)
    b2p = b2.reshape(C, 1).astype(jnp.float32)

    # Column wrap-around masks for the flat-shift trick (depend only on dx),
    # tiled per image in the wrapper so the kernel applies them with plain muls.
    jj = jnp.arange(HW, dtype=jnp.int32) % W
    mask2 = jnp.stack([jj >= 1, jj < W - 1]).astype(dt)     # (2, HW): dx=-1, dx=+1
    mask2 = jnp.tile(mask2, (1, NB))                        # (2, NB*HW)

    TAPS = [(dy, dx) for dy in (-1, 0, 1) for dx in (-1, 0, 1)]

    def kernel(x_ref, w1_ref, b1_ref, w2_ref, b2_ref, mask_ref, out_ref, xs_ref):
        sdt = xs_ref.dtype
        bases = [LPAD + i * SPAN for i in range(NB)]

        # -- refresh only the zero-pad regions of the scratch (interior is fully
        #    overwritten below); done every step so megacore splitting is safe.
        xs_ref[:, 0:LPAD] = jnp.zeros((CP, LPAD), sdt)
        for base in bases:
            xs_ref[:, base + HW:base + SPAN] = jnp.zeros((CP, SPAN - HW), sdt)
            if CP > C:
                xs_ref[C:CP, base:base + HW] = jnp.zeros((CP - C, HW), sdt)

        # -- column-wrap masks: broadcast ONCE per step, reused by both convs.
        mask_m1 = jnp.broadcast_to(mask_ref[0:1, :], (CP, NB * HW))
        mask_p1 = jnp.broadcast_to(mask_ref[1:2, :], (CP, NB * HW))

        def conv3x3(w_ref):
            # Nine lane-shifted views of the padded scratch form the im2col
            # pieces; each piece is (CP, NB*HW) with the NB images side by side.
            pieces = []
            for dy, dx in TAPS:
                off = dy * W + dx
                views = [xs_ref[:, b + off:b + off + HW] for b in bases]
                p = views[0] if NB == 1 else jnp.concatenate(views, axis=1)
                if dx == -1:
                    p = p * mask_m1
                elif dx == 1:
                    p = p * mask_p1
                pieces.append(p)
            if CP >= 32:
                # accumulate-over-taps: keeps only (CP, NB*HW) live per tap.
                acc = jnp.dot(w_ref[:, 0:CP], pieces[0],
                              preferred_element_type=jnp.float32)
                for t in range(1, 9):
                    acc = acc + jnp.dot(w_ref[:, t * CP:(t + 1) * CP], pieces[t],
                                        preferred_element_type=jnp.float32)
                return acc
            slab = jnp.concatenate(pieces, axis=0)          # (9*CP, NB*HW)
            return jnp.dot(w_ref[...], slab,
                           preferred_element_type=jnp.float32)  # (C, NB*HW) f32

        # ---- conv1 + bias + ReLU ----
        for i, base in enumerate(bases):
            xs_ref[0:C, base:base + HW] = x_ref[i]          # lane-aligned store
        h1 = jnp.maximum(conv3x3(w1_ref) + b1_ref[...], 0.0)

        # ---- conv2 + bias + residual (fused epilogue) ----
        # TODO(synk): when dt is bf16 the intermediate h1 is rounded to bf16
        # before conv2 (scratch dtype == input dtype); f32 inputs stay exact.
        for i, base in enumerate(bases):
            xs_ref[0:C, base:base + HW] = h1[:, i * HW:(i + 1) * HW].astype(sdt)
        y = conv3x3(w2_ref) + b2_ref[...]
        for i in range(NB):
            out_ref[i] = (y[:, i * HW:(i + 1) * HW]
                          + x_ref[i].astype(jnp.float32)).astype(out_ref.dtype)

    vmem_limit = int(min(3 * vmem_cap // 4, max(4 * step_bytes(NB), 16 * 2**20)))

    cost = pl.CostEstimate(
        flops=int(2 * 2 * C * 9 * CP * HW * N),             # two 3x3 convs
        transcendentals=0,
        bytes_accessed=int(2 * N * C * HW * itemsize        # x in + out
                           + 2 * C * 9 * CP * itemsize      # weights
                           + 2 * C * 4                      # biases (f32)
                           + 2 * NB * HW * itemsize),       # masks
    )

    out = pl.pallas_call(
        kernel,
        out_shape=jax.ShapeDtypeStruct((N, C, HW), dt),
        grid_spec=pltpu.PrefetchScalarGridSpec(
            num_scalar_prefetch=0,
            grid=(N // NB,),
            in_specs=[
                pl.BlockSpec((NB, C, HW), lambda n: (n, 0, 0)),
                pl.BlockSpec((C, 9 * CP), lambda n: (0, 0)),
                pl.BlockSpec((C, 1), lambda n: (0, 0)),
                pl.BlockSpec((C, 9 * CP), lambda n: (0, 0)),
                pl.BlockSpec((C, 1), lambda n: (0, 0)),
                pl.BlockSpec((2, NB * HW), lambda n: (0, 0)),
            ],
            out_specs=pl.BlockSpec((NB, C, HW), lambda n: (n, 0, 0)),
            scratch_shapes=[pltpu.VMEM((CP, WTOT), dt)],
        ),
        compiler_params=pltpu.CompilerParams(
            dimension_semantics=("parallel",),
            vmem_limit_bytes=vmem_limit,
        ),
        cost_estimate=cost,
    )(xf, w1p, b1p, w2p, b2p, mask2)

    return out.reshape(N, C, H, W)


def _reference(x, w1, b1, w2, b2):
    dn = ('NCHW', 'OIHW', 'NCHW')
    y = jax.lax.conv_general_dilated(x, w1, (1, 1), 'SAME', dimension_numbers=dn)
    y = y + b1[None, :, None, None]
    y = jnp.maximum(y, 0.0)
    y = jax.lax.conv_general_dilated(y, w2, (1, 1), 'SAME', dimension_numbers=dn)
    y = y + b2[None, :, None, None]
    return y + x


if __name__ == "__main__":
    key = jax.random.PRNGKey(0)
    N, C, H, W = 2, 4, 16, 16

    kx, kw1, kb1, kw2, kb2 = jax.random.split(key, 5)
    x = jax.random.normal(kx, (N, C, H, W), jnp.float32)
    # deterministic synthetic parameters (shapes match nn.Conv2d(C, C, 3, 1, 1))
    fan_in = C * 3 * 3
    w1 = jax.random.normal(kw1, (C, C, 3, 3), jnp.float32) / jnp.sqrt(fan_in)
    b1 = jax.random.normal(kb1, (C,), jnp.float32) * 0.1
    w2 = jax.random.normal(kw2, (C, C, 3, 3), jnp.float32) / jnp.sqrt(fan_in)
    b2 = jax.random.normal(kb2, (C,), jnp.float32) * 0.1

    out = jax.block_until_ready(residual_block(x, w1, b1, w2, b2))
    ref = jax.block_until_ready(_reference(x, w1, b1, w2, b2))

    assert out.shape == (N, C, H, W), out.shape
    max_err = float(jnp.max(jnp.abs(out - ref)))
    assert jnp.allclose(out, ref, atol=1e-3, rtol=1e-3), max_err
    print("KERNEL_OK")
</pallas_src>

<mosaic_0001>
module attributes {stable_mosaic.version = 11 : i64} {
  func.func @kernel(%arg0: i32, %arg1: memref<1x4x256xf32, #tpu.memory_space<vmem>>, %arg2: memref<4x72xf32, #tpu.memory_space<vmem>>, %arg3: memref<4x1xf32, #tpu.memory_space<vmem>>, %arg4: memref<4x72xf32, #tpu.memory_space<vmem>>, %arg5: memref<4x1xf32, #tpu.memory_space<vmem>>, %arg6: memref<2x256xf32, #tpu.memory_space<vmem>>, %arg7: memref<1x4x256xf32, #tpu.memory_space<vmem>>, %arg8: memref<8x512xf32, #tpu.memory_space<vmem>>) attributes {dimension_semantics = [#tpu.dimension_semantics<parallel>], iteration_bounds = array<i64: 2>, scalar_prefetch = 0 : i64, scratch_operands = 1 : i64, tpu.core_type = #tpu.core_type<tc>, window_params = [{transform_indices = @transform_0, window_bounds = array<i64: 1, 4, 256>}, {pipeline_mode = #tpu.pipeline_mode<synchronous>, transform_indices = @transform_1, window_bounds = array<i64: 4, 72>}, {pipeline_mode = #tpu.pipeline_mode<synchronous>, transform_indices = @transform_2, window_bounds = array<i64: 4, 1>}, {pipeline_mode = #tpu.pipeline_mode<synchronous>, transform_indices = @transform_3, window_bounds = array<i64: 4, 72>}, {pipeline_mode = #tpu.pipeline_mode<synchronous>, transform_indices = @transform_4, window_bounds = array<i64: 4, 1>}, {pipeline_mode = #tpu.pipeline_mode<synchronous>, transform_indices = @transform_5, window_bounds = array<i64: 2, 256>}, {transform_indices = @transform_6, window_bounds = array<i64: 1, 4, 256>}]} {
    %cst = arith.constant 0.000000e+00 : f32
    %0 = vector.broadcast %cst : f32 to vector<8x128xf32>
    %c0 = arith.constant 0 : index
    %c0_0 = arith.constant 0 : index
    %1 = vector.load %arg8[%c0, %c0_0] : memref<8x512xf32, #tpu.memory_space<vmem>>, vector<8x128xf32>
    tpu.vector_store %arg8[%c0, %c0_0], %0 {strides = array<i32>} : memref<8x512xf32, #tpu.memory_space<vmem>>, vector<8x128xf32>,
    %cst_1 = arith.constant 0.000000e+00 : f32
    %2 = vector.broadcast %cst_1 : f32 to vector<8x128xf32>
    %c0_2 = arith.constant 0 : index
    %c384 = arith.constant 384 : index
    %3 = vector.load %arg8[%c0_2, %c384] : memref<8x512xf32, #tpu.memory_space<vmem>>, vector<8x128xf32>
    tpu.vector_store %arg8[%c0_2, %c384], %2 {strides = array<i32>} : memref<8x512xf32, #tpu.memory_space<vmem>>, vector<8x128xf32>,
    %cst_3 = arith.constant 0.000000e+00 : f32
    %4 = vector.broadcast %cst_3 : f32 to vector<4x256xf32>
    %c4 = arith.constant 4 : index
    %c128 = arith.constant 128 : index
    %5 = vector.load %arg8[%c4, %c128] : memref<8x512xf32, #tpu.memory_space<vmem>>, vector<4x256xf32>
    tpu.vector_store %arg8[%c4, %c128], %4 {strides = array<i32>} : memref<8x512xf32, #tpu.memory_space<vmem>>, vector<4x256xf32>,
    %c0_4 = arith.constant 0 : index
    %c0_5 = arith.constant 0 : index
    %6 = vector.load %arg6[%c0_4, %c0_5] : memref<2x256xf32, #tpu.memory_space<vmem>>, vector<1x256xf32>
    %7 = vector.shape_cast %6 : vector<1x256xf32> to vector<1x256xf32>
    %8 = vector.broadcast %7 : vector<1x256xf32> to vector<8x256xf32>
    %c1 = arith.constant 1 : index
    %c0_6 = arith.constant 0 : index
    %9 = vector.load %arg6[%c1, %c0_6] : memref<2x256xf32, #tpu.memory_space<vmem>>, vector<1x256xf32>
    %10 = vector.shape_cast %9 : vector<1x256xf32> to vector<1x256xf32>
    %11 = vector.broadcast %10 : vector<1x256xf32> to vector<8x256xf32>
    %c0_7 = arith.constant 0 : index
    %c0_8 = arith.constant 0 : index
    %c0_9 = arith.constant 0 : index
    %12 = vector.load %arg1[%c0_7, %c0_8, %c0_9] : memref<1x4x256xf32, #tpu.memory_space<vmem>>, vector<1x4x256xf32>
    %13 = vector.shape_cast %12 : vector<1x4x256xf32> to vector<4x256xf32>
    %c0_10 = arith.constant 0 : index
    %c128_11 = arith.constant 128 : index
    %14 = vector.load %arg8[%c0_10, %c128_11] : memref<8x512xf32, #tpu.memory_space<vmem>>, vector<4x256xf32>
    tpu.vector_store %arg8[%c0_10, %c128_11], %13 {strides = array<i32>} : memref<8x512xf32, #tpu.memory_space<vmem>>, vector<4x256xf32>,
    %c0_12 = arith.constant 0 : index
    %c111 = arith.constant 111 : index
    %15 = vector.load %arg8[%c0_12, %c111] : memref<8x512xf32, #tpu.memory_space<vmem>>, vector<8x256xf32>
    %16 = arith.mulf %15, %8 : vector<8x256xf32>
    %c0_13 = arith.constant 0 : index
    %c112 = arith.constant 112 : index
    %17 = vector.load %arg8[%c0_13, %c112] : memref<8x512xf32, #tpu.memory_space<vmem>>, vector<8x256xf32>
    %c0_14 = arith.constant 0 : index
    %c113 = arith.constant 113 : index
    %18 = vector.load %arg8[%c0_14, %c113] : memref<8x512xf32, #tpu.memory_space<vmem>>, vector<8x256xf32>
    %19 = arith.mulf %18, %11 : vector<8x256xf32>
    %c0_15 = arith.constant 0 : index
    %c127 = arith.constant 127 : index
    %20 = vector.load %arg8[%c0_15, %c127] : memref<8x512xf32, #tpu.memory_space<vmem>>, vector<8x256xf32>
    %21 = arith.mulf %20, %8 : vector<8x256xf32>
    %c0_16 = arith.constant 0 : index
    %c128_17 = arith.constant 128 : index
    %22 = vector.load %arg8[%c0_16, %c128_17] : memref<8x512xf32, #tpu.memory_space<vmem>>, vector<8x256xf32>
    %c0_18 = arith.constant 0 : index
    %c129 = arith.constant 129 : index
    %23 = vector.load %arg8[%c0_18, %c129] : memref<8x512xf32, #tpu.memory_space<vmem>>, vector<8x256xf32>
    %24 = arith.mulf %23, %11 : vector<8x256xf32>
    %c0_19 = arith.constant 0 : index
    %c143 = arith.constant 143 : index
    %25 = vector.load %arg8[%c0_19, %c143] : memref<8x512xf32, #tpu.memory_space<vmem>>, vector<8x256xf32>
    %26 = arith.mulf %25, %8 : vector<8x256xf32>
    %c0_20 = arith.constant 0 : index
    %c144 = arith.constant 144 : index
    %27 = vector.load %arg8[%c0_20, %c144] : memref<8x512xf32, #tpu.memory_space<vmem>>, vector<8x256xf32>
    %c0_21 = arith.constant 0 : index
    %c145 = arith.constant 145 : index
    %28 = vector.load %arg8[%c0_21, %c145] : memref<8x512xf32, #tpu.memory_space<vmem>>, vector<8x256xf32>
    %29 = arith.mulf %28, %11 : vector<8x256xf32>
    %30 = tpu.concatenate %16, %17, %19, %21, %22, %24, %26, %27, %29 in 0 : vector<8x256xf32>, vector<8x256xf32>, vector<8x256xf32>, vector<8x256xf32>, vector<8x256xf32>, vector<8x256xf32>, vector<8x256xf32>, vector<8x256xf32>, vector<8x256xf32> -> vector<72x256xf32>
    %c0_22 = arith.constant 0 : index
    %c0_23 = arith.constant 0 : index
    %31 = vector.load %arg2[%c0_22, %c0_23] : memref<4x72xf32, #tpu.memory_space<vmem>>, vector<4x72xf32>
    %cst_24 = arith.constant dense<0.000000e+00> : vector<4x256xf32>
    %32 = tpu.matmul %31, %30, %cst_24 {dimension_numbers = #tpu.dot_dimension_numbers<[1], [0], [0], [1], [0, 0, 1, 1], [], []>} : vector<4x72xf32>, vector<72x256xf32>, vector<4x256xf32> -> vector<4x256xf32>
    %c0_25 = arith.constant 0 : index
    %c0_26 = arith.constant 0 : index
    %33 = vector.load %arg3[%c0_25, %c0_26] : memref<4x1xf32, #tpu.memory_space<vmem>>, vector<4x1xf32>
    %34 = vector.broadcast %33 : vector<4x1xf32> to vector<4x256xf32>
    %35 = arith.addf %32, %34 : vector<4x256xf32>
    %cst_27 = arith.constant 0.000000e+00 : f32
    %36 = vector.broadcast %cst_27 : f32 to vector<4x256xf32>
    %37 = arith.maximumf %35, %36 : vector<4x256xf32>
    %c0_28 = arith.constant 0 : index
    %c128_29 = arith.constant 128 : index
    %38 = vector.load %arg8[%c0_28, %c128_29] : memref<8x512xf32, #tpu.memory_space<vmem>>, vector<4x256xf32>
    tpu.vector_store %arg8[%c0_28, %c128_29], %37 {strides = array<i32>} : memref<8x512xf32, #tpu.memory_space<vmem>>, vector<4x256xf32>,
    %c0_30 = arith.constant 0 : index
    %c111_31 = arith.constant 111 : index
    %39 = vector.load %arg8[%c0_30, %c111_31] : memref<8x512xf32, #tpu.memory_space<vmem>>, vector<8x256xf32>
    %40 = arith.mulf %39, %8 : vector<8x256xf32>
    %c0_32 = arith.constant 0 : index
    %c112_33 = arith.constant 112 : index
    %41 = vector.load %arg8[%c0_32, %c112_33] : memref<8x512xf32, #tpu.memory_space<vmem>>, vector<8x256xf32>
    %c0_34 = arith.constant 0 : index
    %c113_35 = arith.constant 113 : index
    %42 = vector.load %arg8[%c0_34, %c113_35] : memref<8x512xf32, #tpu.memory_space<vmem>>, vector<8x256xf32>
    %43 = arith.mulf %42, %11 : vector<8x256xf32>
    %c0_36 = arith.constant 0 : index
    %c127_37 = arith.constant 127 : index
    %44 = vector.load %arg8[%c0_36, %c127_37] : memref<8x512xf32, #tpu.memory_space<vmem>>, vector<8x256xf32>
    %45 = arith.mulf %44, %8 : vector<8x256xf32>
    %c0_38 = arith.constant 0 : index
    %c128_39 = arith.constant 128 : index
    %46 = vector.load %arg8[%c0_38, %c128_39] : memref<8x512xf32, #tpu.memory_space<vmem>>, vector<8x256xf32>
    %c0_40 = arith.constant 0 : index
    %c129_41 = arith.constant 129 : index
    %47 = vector.load %arg8[%c0_40, %c129_41] : memref<8x512xf32, #tpu.memory_space<vmem>>, vector<8x256xf32>
    %48 = arith.mulf %47, %11 : vector<8x256xf32>
    %c0_42 = arith.constant 0 : index
    %c143_43 = arith.constant 143 : index
    %49 = vector.load %arg8[%c0_42, %c143_43] : memref<8x512xf32, #tpu.memory_space<vmem>>, vector<8x256xf32>
    %50 = arith.mulf %49, %8 : vector<8x256xf32>
    %c0_44 = arith.constant 0 : index
    %c144_45 = arith.constant 144 : index
    %51 = vector.load %arg8[%c0_44, %c144_45] : memref<8x512xf32, #tpu.memory_space<vmem>>, vector<8x256xf32>
    %c0_46 = arith.constant 0 : index
    %c145_47 = arith.constant 145 : index
    %52 = vector.load %arg8[%c0_46, %c145_47] : memref<8x512xf32, #tpu.memory_space<vmem>>, vector<8x256xf32>
    %53 = arith.mulf %52, %11 : vector<8x256xf32>
    %54 = tpu.concatenate %40, %41, %43, %45, %46, %48, %50, %51, %53 in 0 : vector<8x256xf32>, vector<8x256xf32>, vector<8x256xf32>, vector<8x256xf32>, vector<8x256xf32>, vector<8x256xf32>, vector<8x256xf32>, vector<8x256xf32>, vector<8x256xf32> -> vector<72x256xf32>
    %c0_48 = arith.constant 0 : index
    %c0_49 = arith.constant 0 : index
    %55 = vector.load %arg4[%c0_48, %c0_49] : memref<4x72xf32, #tpu.memory_space<vmem>>, vector<4x72xf32>
    %cst_50 = arith.constant dense<0.000000e+00> : vector<4x256xf32>
    %56 = tpu.matmul %55, %54, %cst_50 {dimension_numbers = #tpu.dot_dimension_numbers<[1], [0], [0], [1], [0, 0, 1, 1], [], []>} : vector<4x72xf32>, vector<72x256xf32>, vector<4x256xf32> -> vector<4x256xf32>
    %c0_51 = arith.constant 0 : index
    %c0_52 = arith.constant 0 : index
    %57 = vector.load %arg5[%c0_51, %c0_52] : memref<4x1xf32, #tpu.memory_space<vmem>>, vector<4x1xf32>
    %58 = vector.broadcast %57 : vector<4x1xf32> to vector<4x256xf32>
    %59 = arith.addf %56, %58 : vector<4x256xf32>
    %c0_53 = arith.constant 0 : index
    %c0_54 = arith.constant 0 : index
    %c0_55 = arith.constant 0 : index
    %60 = vector.load %arg1[%c0_53, %c0_54, %c0_55] : memref<1x4x256xf32, #tpu.memory_space<vmem>>, vector<1x4x256xf32>
    %61 = vector.shape_cast %60 : vector<1x4x256xf32> to vector<4x256xf32>
    %62 = arith.addf %59, %61 : vector<4x256xf32>
    %c0_56 = arith.constant 0 : index
    %c0_57 = arith.constant 0 : index
    %c0_58 = arith.constant 0 : index
    %63 = vector.load %arg7[%c0_56, %c0_57, %c0_58] : memref<1x4x256xf32, #tpu.memory_space<vmem>>, vector<1x4x256xf32>
    %64 = vector.shape_cast %63 : vector<1x4x256xf32> to vector<4x256xf32>
    %65 = vector.shape_cast %62 : vector<4x256xf32> to vector<1x4x256xf32>
    tpu.vector_store %arg7[%c0_56, %c0_57, %c0_58], %65 {strides = array<i32>} : memref<1x4x256xf32, #tpu.memory_space<vmem>>, vector<1x4x256xf32>,
    return
  }
  func.func @transform_0(%arg0: i32) -> (i32, i32, i32) {
    %c0_i32 = arith.constant 0 : i32
    %c0_i32_0 = arith.constant 0 : i32
    %c0_i32_1 = arith.constant 0 : i32
    return %arg0, %c0_i32, %c0_i32_0 : i32, i32, i32
  }
  func.func @transform_1(%arg0: i32) -> (i32, i32) {
    %c0_i32 = arith.constant 0 : i32
    %c0_i32_0 = arith.constant 0 : i32
    %c0_i32_1 = arith.constant 0 : i32
    return %c0_i32, %c0_i32_0 : i32, i32
  }
  func.func @transform_2(%arg0: i32) -> (i32, i32) {
    %c0_i32 = arith.constant 0 : i32
    %c0_i32_0 = arith.constant 0 : i32
    %c0_i32_1 = arith.constant 0 : i32
    return %c0_i32, %c0_i32_0 : i32, i32
  }
  func.func @transform_3(%arg0: i32) -> (i32, i32) {
    %c0_i32 = arith.constant 0 : i32
    %c0_i32_0 = arith.constant 0 : i32
    %c0_i32_1 = arith.constant 0 : i32
    return %c0_i32, %c0_i32_0 : i32, i32
  }
  func.func @transform_4(%arg0: i32) -> (i32, i32) {
    %c0_i32 = arith.constant 0 : i32
    %c0_i32_0 = arith.constant 0 : i32
    %c0_i32_1 = arith.constant 0 : i32
    return %c0_i32, %c0_i32_0 : i32, i32
  }
  func.func @transform_5(%arg0: i32) -> (i32, i32) {
    %c0_i32 = arith.constant 0 : i32
    %c0_i32_0 = arith.constant 0 : i32
    %c0_i32_1 = arith.constant 0 : i32
    return %c0_i32, %c0_i32_0 : i32, i32
  }
  func.func @transform_6(%arg0: i32) -> (i32, i32, i32) {
    %c0_i32 = arith.constant 0 : i32
    %c0_i32_0 = arith.constant 0 : i32
    %c0_i32_1 = arith.constant 0 : i32
    return %arg0, %c0_i32, %c0_i32_0 : i32, i32, i32
  }
}

</mosaic_0001>

<bundles_post_ra>
// kernel: tpu_custom_call.1
= control target key start
LH: loop header
LB: loop body
LE: loop exit
PB: predicated region body
PF: predicated region fallthrough
CT: control target
= control target key end

     0   :  { %11 = vsyncpa [#allocation4], 0  ;;  %s1832_s0 = inlined_call_operand.hbm [shape: f32[2,4,256], index: 0, kind: input, shape index: {}]   ;;  %s1833_s1 = inlined_call_operand.vmem [shape: f32[4,72], index: 1, kind: input, shape index: {}]   ;;  %s1834_s2 = inlined_call_operand.vmem [shape: f32[4,1], index: 2, kind: input, shape index: {}]   ;;  %s1835_s3 = inlined_call_operand.vmem [shape: f32[4,72], index: 3, kind: input, shape index: {}]   ;;  %s1836_s4 = inlined_call_operand.vmem [shape: f32[4,1], index: 4, kind: input, shape index: {}]   ;;  %s1837_s5 = inlined_call_operand.vmem [shape: f32[2,256], index: 5, kind: input, shape index: {}]   ;;  %s1838_s6 = inlined_call_operand.hbm [shape: f32[2,4,256], index: 6, kind: output, shape index: {}]  }
   0x1   :  { %13 = vsyncpa [#allocation4 + $0x1], 0 }
   0x2   :  { %14 = vsyncpa [#allocation5], 0 }
   0x3   :  { %16 = vsyncpa [#allocation5 + $0x1], 0  ;;  %s1398_s21 = smov 0   ;;  %s1400_s22 = smov 0  }
   0x4   :  { %s1402_s23 = smov 0   ;;  %s1404_s24 = smov 0  }
   0x5 LB: > { %s1419_s25 = sadd.s32 4294967295, %s1347_s24   ;;  %s958_s26 = sadd.s32 4294967294, %s1347_s24   ;;  %s1347_s24 = sphi %s1404_s24, %s1848_s24   ;;  %s1343_s23 = sphi %s1402_s23, %s1847_s23   ;;  %s1339_s22 = sphi %s1400_s22, %s1846_s22   ;;  %s1335_s21 = sphi %s1398_s21, %s1845_s21  }
   0x6   : > { %s1423_s27 = sadd.s32 1, %s1347_s24   ;;  %s29_s28 = sadd.s32 1, %s1343_s23 }
   0x7   : > { %s26_s29 = ssub.s32 %s1347_s24, %s1423_s27  ;;  %p36_p0 = scmp.ne.s32.totalorder %s1343_s23, %s1339_s22 }
   0x8   : > { %p27_p1 = scmp.eq.s32.totalorder %s26_s29, 0  ;;  %p37_p2 = scmp.eq.s32.totalorder %s1347_s24, 0 }
   0x9   : > { %p42_p3 = scmp.ne.s32.totalorder %s1339_s22, %s1335_s21  ;;  %p43_p4 = scmp.eq.s32.totalorder %s1419_s25, 0 }
   0xa   : > { %s1435_s30 = scalar_select %p27_p1, %s1343_s23, %s29_s28  }
   0xb   : > { %p1437_p5 = por %p37_p2, %p36_p0  ;;  %p1441_p6 = por %p43_p4, %p42_p3 }
   0xc   : > { %p171_p7 = scmp.eq.s32.totalorder %s1419_s25, 1  ;;  %p177_p8 = scmp.eq.s32.totalorder %s958_s26, 1 }
   0xd   : > { %p991_p10 = scmp.lt.s32.totalorder %s1347_s24, 2  ;;  %s212_s11 = sand.u32 1, %s1343_s23  }
   0xe   : > { %p1448_p11 = por %p171_p7, %p36_p0  ;;  %p1452_p12 = por %p177_p8, %p42_p3 }
   0xf   : > { %s977_s12 = sshll.u32 %s1347_s24, 3  ;;  %s961_s13 = sshll.u32 %s212_s11, 3 }
  0x10   : > { %s221_s16 = scalar_lea.hbm %s1832_s0, %s977_s12  ;;  %s216_s18 = scalar_lea.vmem [#allocation3], %s961_s13 }
  0x11   : > { %s223_s17 = sshll.u32 %s221_s16, 4  ;;  %s225_s19 = sshll.u32 %s216_s18, 4  ;;  %s224_s17 = int_to_ptr.hbm [resolvable:$true] %s223_s17  ;;  %s226_s19 = int_to_ptr.vmem [resolvable:$true] %s225_s19 }
  0x12   : > { %p1463_p13 = pnand %p991_p10, %p1437_p5  ;;  %p964_p0 = scmp.ge.s32.totalorder %s1347_s24, 1 }
  0x13   : > { %p230_p1 = scmp.lt.s32.totalorder %s1347_s24, 3  ;;  %s213_s26 = scalar_lea.sflag [#allocation4], %s212_s11 }
  0x14   : > { %s1251_s28 = sshra.s32 %s224_s17, 4  ;;  %p1255_p3 = pneg %p1463_p13  ;;  %s1252_s28 = int_to_ptr.hbm [resolvable:$true] %s1251_s28 }
  0x15   : > { %s1253_s29 = scalar_lea.hbm %s1252_s28, 8  ;;  %s1258_s7 = scalar_lea.hbm %s1832_s0, 16 }
  0x16   : > { %p1254_p2 = scmp.ne.s32.totalorder %s1252_s28, %s1253_s29  ;;  %p1259_p5 = scmp.lt.s32.totalorder %s1252_s28, %s1832_s0 }
  0x17   : > { %p1260_p8 = scmp.lt.s32.totalorder %s1258_s7, %s1253_s29 }
  0x18   : > { %p1256_p4 = pnand %p1255_p3, %p1254_p2 }
  0x19   : > { %p1261_p10 = por %p1260_p8, %p1259_p5 }
  0x1a   : > { %p1257_p7 = pneg %p1256_p4 }
  0x1c   : > { %p1262_p9 = pnand %p1261_p10, %p1257_p7 }
  0x1e   : > { %1265 = shalt.err (!%p1262_p9)
}
  0x1f   : > { %986 = dma.hbm_to_vmem [thread:$0]  (!%p1463_p13), %s224_s17, 128, %s226_s19, %s213_s26  }
  0x20   : > { %p231_p2 = pnand %p964_p0, %p230_p1 }
  0x21   : > { %s1484_s11 = sand.u32 (!%p231_p2), 1, %s1339_s22  }
  0x22   : > { %234 = sbr.rel (%p231_p2) target bundleno = 1056 (0x420), region = 44  ;;  %s965_s16 = sshll.u32 (!%p231_p2), %s1484_s11, 3 }
  0x23   : > { %s237_s18 = scalar_lea.sflag (!%p231_p2), [#allocation4], %s1484_s11  ;;  %s240_s28 = scalar_lea.vmem (!%p231_p2), [#allocation3], %s965_s16 }
  0x27   : > { %1326 = dma.done.wait (%p1441_p6), %s237_s18, 128  }
  0x28   : > { %1328 = vsyncadd (%p1441_p6), %s237_s18, 4294967168  ;;  %v1349_v0 = vmov 0.0   ;;  %v967_v1 = vld [vmem:[%s1837_s5 + $0x1] ss:$2 sm:$0x3]  ;;  %v283_v5 = vld [vmem:[%s240_s28] sm:$0xff] }
  0x29   : > { %272 = vst [vmem:[#allocation2 + $0x10] sm:$0xf0] %v1349_v0  ;;  %v274_v2 = vld [vmem:[%s1837_s5] ss:$2 sm:$0x3]  ;;  %v281_v3 = vperm.slane %v967_v1, 0 }
  0x2a   : > { %273 = vst [vmem:[#allocation2 + $0x18] sm:$0xf0] %v1349_v0  ;;  %v1502_v4 = vperm.slane %v274_v2, 0  ;;  %s1350_s8 = smov 17   ;;  %s1351_s29 = smov 15   ;;  %v282_v6 = vperm.slane %v967_v1, 1 }
  0x2b   : > { %285 = vst [vmem:[#allocation1] ss:$2 sm:$0xff] %v283_v5  ;;  %358 = vrot.lane.b32.xlu0 %v281_v3, %s1350_s8  ;;  %s1352_s12 = smov 1   ;;  %v1506_v7 = vperm.slane %v274_v2, 1  ;;  %s1353_s13 = smov 127   ;;  %vm350_vm0 = vcmask 121856  }
  0x2c   : > { %346 = vrot.lane.b32.xlu1 %v1502_v4, %s1351_s29  ;;  %334 = vrot.lane.b32.xlu2 %v281_v3, %s1352_s12  ;;  %s1354_s7 = smov 113   ;;  %s1355_s14 = smov 95   ;;  %vm311_vm1 = vcmask 924672   ;;  %vm362_vm2 = vcmask 138240   ;;  %vm338_vm3 = vcmask 7168   ;;  %vm323_vm4 = vcmask 1039360  }
  0x2d   : > { %s1356_s15 = smov 111   ;;  %s1357_s18 = smov 94   ;;  %vm299_vm5 = vcmask 908288   ;;  %vm443_vm6 = vcmask 777216   ;;  %v1362_v2 = vmov 0   ;;  %vm455_vm7 = vcmask 769024  }
  0x2e   : > { %s1358_s28 = smov 96   ;;  %s1359_s17 = smov 110   ;;  %1144 = vset.pattern.permute.xlu2 %v1362_v2  ;;  %1250 = vset.pattern.permute.xlu0 %v1362_v2  ;;  %vm431_vm8 = vcmask 785408   ;;  %vm419_vm9 = vcmask 900096   ;;  %vm390_vm10 = vcmask 1031168   ;;  %vm402_vm11 = vcmask 916480  }
  0x2f   : > { %s1360_s19 = smov 126   ;;  %s1361_s20 = smov 112   ;;  %vm558_vm12 = vcmask 588800   ;;  %vm867_vm13 = vcmask 1043456  }
  0x32   : > { %v286_v8 = vld.sshfl [vmem:[#allocation1] sm:$0xff pattern:$0x75316420]  ;;  %v287_v9 = vld.sshfl [vmem:[#allocation1 + $0x8] sm:$0xff pattern:$0x75316420] }
  0x33   : > { %290 = vst [vmem:[#allocation2 + $0x10] sm:$0xf] %v286_v8  ;;  %360 = vrot.lane.b32.xlu0 %v282_v6, %s1350_s8 }
  0x34   : > { %348 = vrot.lane.b32.xlu1 %v1506_v7, %s1351_s29  ;;  %291 = vst [vmem:[#allocation2 + $0x18] sm:$0xf] %v287_v9  ;;  %336 = vrot.lane.b32.xlu2 %v282_v6, %s1352_s12 }
  0x35   : > { %857 = vst [vmem:[#allocation1] ss:$2 sm:$0xff] %v283_v5 }
  0x3a   : > { %v1516_v10 = vld [vmem:[#allocation2 + $0x10] sm:$0xff] }
  0x3b   : > { %319 = vrot.lane.b32.xlu0 %v1502_v4, %s1353_s13  ;;  %v1518_v11 = vld [vmem:[#allocation2 + $0x18] sm:$0xff]  ;;  %v1074_v48 = vpack.i.bf16 %v1516_v10, %v1349_v0 }
  0x3c   : > { %321 = vrot.lane.b32.xlu1 %v1506_v7, %s1353_s13  ;;  %307 = vrot.lane.b32.xlu2 %v281_v3, %s1354_s7  ;;  %v1039_v12 = vpack.i.bf16 %v1518_v11, %v1516_v10 }
  0x43   : > { %309 = vrot.lane.b32.xlu0 %v282_v6, %s1354_s7 }
  0x44   : > { %441 = vrot.lane.b32.xlu1 %v1349_v0, %s1355_s14 }
  0x4b   : > { %1040 = vrot.lane.b32.xlu0 %v1039_v12, %s1355_s14 }
  0x53   : > { %1045 = vrot.lane.b32.xlu0 %v1039_v12, %s1356_s15 }
  0x86   : > { %v1528_v15 = vpop.permute.xlu2 %334 }
  0x87   : > { %v343_v41 = vmul.f32 %v1528_v15, %v1516_v10 }
  0x8e   : > { %v337_v20 = vpop.permute.xlu2 %336 }
  0x8f   : > { %v1538_v21 = vmul.f32 0.0, %v337_v20  ;;  %v1577_v40 = vsel %vm338_vm3, %v1528_v15, %v337_v20 }
  0x90   : > { %v344_v42 = vmul.f32 %v1577_v40, %v1518_v11 }
  0x92   : > { %v1059_v43 = vpack.i.bf16 %v344_v42, %v343_v41 }
  0x96   : > { %v308_v23 = vpop.permute.xlu2 %307 }
  0x97   : > { %v1549_v27 = vmul.f32 0.0, %v308_v23 }
  0x9d   : > { %v1524_v13 = vpop.permute.xlu0 %358 }
  0x9e   : > { %v1526_v14 = vpop.permute.xlu1 %346  ;;  %v367_v37 = vmul.f32 %v1524_v13, %v1516_v10 }
  0x9f   : > { %v355_v33 = vmul.f32 %v1526_v14, %v1516_v10 }
  0xa5   : > { %v361_v16 = vpop.permute.xlu0 %360 }
  0xa6   : > { %v1530_v17 = vmul.f32 0.0, %v361_v16  ;;  %v349_v18 = vpop.permute.xlu1 %348  ;;  %v1560_v31 = vsel %vm362_vm2, %v1524_v13, %v361_v16 }
  0xa7   : > { %v1532_v19 = vmul.f32 0.0, %v349_v18  ;;  %v1547_v26 = vsel %vm350_vm0, %v1526_v14, %v349_v18  ;;  %v368_v36 = vmul.f32 %v1560_v31, %v1518_v11 }
  0xa8   : > { %453 = vrot.lane.b32.xlu2 %v1530_v17, %s1357_s18  ;;  %v356_v34 = vmul.f32 %v1547_v26, %v1518_v11 }
  0xa9   : > { %429 = vrot.lane.b32.xlu0 %v1532_v19, %s1358_s28  ;;  %v1049_v39 = vpack.i.bf16 %v368_v36, %v367_v37 }
  0xaa   : > { %v1054_v38 = vpack.i.bf16 %v356_v34, %v355_v33 }
  0xad   : > { %v320_v22 = vpop.permute.xlu0 %319 }
  0xae   : > { %v1542_v24 = vpop.permute.xlu1 %321  ;;  %v1594_v45 = vmul.f32 0.0, %v320_v22 }
  0xaf   : > { %v330_v25 = vmul.f32 %v1518_v11, %v1542_v24  ;;  %v1589_v44 = vsel %vm323_vm4, %v320_v22, %v1542_v24 }
  0xb0   : > { %417 = vrot.lane.b32.xlu2 %v1538_v21, %s1359_s17  ;;  %v329_v46 = vmul.f32 %v1516_v10, %v1589_v44 }
  0xb2   : > { %v1064_v47 = vpack.i.bf16 %v329_v46, %v1594_v45 }
  0xb5   : > { %v1551_v28 = vpop.permute.xlu0 %309 }
  0xb6   : > { %v1554_v29 = vsel %vm311_vm1, %v308_v23, %v1551_v28  ;;  %v318_v30 = vmul.f32 %v1518_v11, %v1551_v28  ;;  %v442_v57 = vpop.permute.xlu1 %441 }
  0xb7   : > { %v317_v32 = vmul.f32 %v1516_v10, %v1554_v29 }
  0xb8   : > { %388 = vrot.lane.b32.xlu1 %v318_v30, %s1360_s19  ;;  %400 = vrot.lane.b32.xlu2 %v330_v25, %s1361_s20 }
  0xb9   : > { %v1069_v35 = vpack.i.bf16 %v317_v32, %v1549_v27 }
  0xbb   : > { %1070 = vrot.lane.b32.xlu0 %v1069_v35, %s1360_s19 }
  0xbd   : > { %v1605_v49 = vpop.permute.xlu0 %1040 }
  0xbe   : > { %v1043_v55 = vunpack.i.h.bf16 %v1605_v49  ;;  %v1042_v56 = vunpack.i.l.bf16 %v1605_v49 }
  0xc0   : > { %1050 = vrot.lane.b32.xlu1 %v1049_v39, %s1357_s18  ;;  %1055 = vrot.lane.b32.xlu2 %v1054_v38, %s1358_s28  ;;  %v444_v58 = vsel %vm443_vm6, %v1042_v56, %v1043_v55  ;;  %v445_v59 = vsel %vm443_vm6, %v1043_v55, %v442_v57 }
  0xc1   : > { %v1079_v60 = vpack.i.bf16 %v445_v59, %v444_v58 }
  0xc3   : > { %297 = vrot.lane.b32.xlu0 %v1506_v7, %s1356_s15 }
  0xc5   : > { %v1607_v50 = vpop.permute.xlu0 %1045 }
  0xc6   : > { %v1048_v51 = vunpack.i.h.bf16 %v1607_v50  ;;  %v1047_v52 = vunpack.i.l.bf16 %v1607_v50 }
  0xc8   : > { %1060 = vrot.lane.b32.xlu1 %v1059_v43, %s1359_s17  ;;  %295 = vrot.lane.b32.xlu2 %v1502_v4, %s1356_s15  ;;  %v409_v53 = vsel %vm299_vm5, %v1047_v52, %v1048_v51 }
  0xc9   : > { %v1084_v54 = vpack.i.bf16 %v409_v53, %v1047_v52 }
  0xcb   : > { %1085 = vrot.lane.b32.xlu0 %v1084_v54, %s1350_s8 }
  0xd0   : > { %1065 = vrot.lane.b32.xlu1 %v1064_v47, %s1361_s20  ;;  %377 = vrot.lane.b32.xlu2 %v1518_v11, %s1353_s13 }
  0xd8   : > { %1075 = vrot.lane.b32.xlu1 %v1074_v48, %s1353_s13  ;;  %1080 = vrot.lane.b32.xlu2 %v1079_v60, %s1350_s8 }
 0x102   : > { %v454_v61 = vpop.permute.xlu2 %453 }
 0x10a   : > { %v418_v62 = vpop.permute.xlu2 %417 }
 0x112   : > { %v401_v63 = vpop.permute.xlu2 %400 }
 0x11a   : > { %v1056_v6 = vpop.permute.xlu2 %1055 }
 0x11b   : > { %v430_v7 = vpop.permute.xlu0 %429  ;;  %v1058_v12 = vunpack.i.h.bf16 %v1056_v6  ;;  %v1057_v16 = vunpack.i.l.bf16 %v1056_v6 }
 0x11d   : > { %v432_v20 = vsel %vm431_vm8, %v1057_v16, %v1058_v12 }
 0x11e   : > { %v1104_v33 = vpack.i.bf16 %v432_v20, %v1057_v16 }
 0x122   : > { %v296_v37 = vpop.permute.xlu2 %295 }
 0x123   : > { %v1636_v52 = vmul.f32 0.0, %v296_v37 }
 0x12a   : > { %v389_v1 = vpop.permute.xlu1 %388  ;;  %v378_v55 = vpop.permute.xlu2 %377 }
 0x12d   : > { %v1071_v25 = vpop.permute.xlu0 %1070 }
 0x12e   : > { %v1073_v35 = vunpack.i.h.bf16 %v1071_v25  ;;  %v1072_v36 = vunpack.i.l.bf16 %v1071_v25 }
 0x130   : > { %v391_v41 = vsel %vm390_vm10, %v1072_v36, %v1073_v35  ;;  %v392_v42 = vsel %vm390_vm10, %v1073_v35, %v389_v1 }
 0x131   : > { %v1134_v47 = vpack.i.bf16 %v392_v42, %v391_v41 }
 0x132   : > { %v1051_v3 = vpop.permute.xlu1 %1050 }
 0x133   : > { %v1053_v4 = vunpack.i.h.bf16 %v1051_v3  ;;  %v1052_v5 = vunpack.i.l.bf16 %v1051_v3 }
 0x135   : > { %v456_v8 = vsel %vm455_vm7, %v1052_v5, %v1053_v4  ;;  %v1634_v48 = vpop.permute.xlu0 %297 }
 0x136   : > { %v1094_v9 = vpack.i.bf16 %v456_v8, %v1052_v5  ;;  %v1640_v53 = vsel %vm299_vm5, %v296_v37, %v1634_v48  ;;  %v457_v5 = vsel %vm455_vm7, %v1053_v4, %v454_v61 }
 0x137   : > { %v305_v57 = vmul.f32 %v1516_v10, %v1640_v53  ;;  %v459_v10 = vld [vmem:[%s1834_s2] sm:$0xf]  ;;  %v1099_v6 = vpack.i.bf16 %v1042_v56, %v457_v5  ;;  %v306_v56 = vmul.f32 %v1518_v11, %v1634_v48 }
 0x138   : > { %1095 = vrot.lane.b32.xlu0 %v1094_v9, %s1350_s8 }
 0x13a   : > { %v1061_v18 = vpop.permute.xlu1 %1060 }
 0x13b   : > { %v1063_v22 = vunpack.i.h.bf16 %v1061_v18  ;;  %v1062_v23 = vunpack.i.l.bf16 %v1061_v18 }
 0x13d   : > { %v420_v30 = vsel %vm419_vm9, %v1062_v23, %v1063_v22  ;;  %v421_v32 = vsel %vm419_vm9, %v1063_v22, %v418_v62 }
 0x13e   : > { %v1114_v34 = vpack.i.bf16 %v421_v32, %v420_v30 }
 0x140   : > { %1115 = vrot.lane.b32.xlu2 %v1114_v34, %s1350_s8  ;;  %1105 = vrot.lane.b32.xlu0 %v1104_v33, %s1350_s8 }
 0x142   : > { %v1066_v38 = vpop.permute.xlu1 %1065 }
 0x143   : > { %v1068_v39 = vunpack.i.h.bf16 %v1066_v38  ;;  %v1067_v9 = vunpack.i.l.bf16 %v1066_v38 }
 0x145   : > { %v404_v43 = vsel %vm402_vm11, %v1068_v39, %v401_v63  ;;  %v403_v61 = vsel %vm402_vm11, %v1067_v9, %v1068_v39 }
 0x146   : > { %v1124_v46 = vpack.i.bf16 %v401_v63, %v404_v43  ;;  %v1139_v63 = vpack.i.bf16 %v305_v57, %v1636_v52  ;;  %v1119_v49 = vpack.i.bf16 %v403_v61, %v1048_v51 }
 0x148   : > { %1125 = vrot.lane.b32.xlu2 %v1124_v46, %s1350_s8  ;;  %1135 = vrot.lane.b32.xlu0 %v1134_v47, %s1350_s8 }
 0x14a   : > { %v1076_v54 = vpop.permute.xlu1 %1075 }
 0x14b   : > { %v1078_v58 = vunpack.i.h.bf16 %v1076_v54  ;;  %v1077_v59 = vunpack.i.l.bf16 %v1076_v54 }
 0x14d   : > { %v380_v60 = vsel %vm323_vm4, %v1078_v58, %v378_v55  ;;  %v379_v62 = vsel %vm323_vm4, %v1077_v59, %v1078_v58 }
 0x14e   : > { %v1129_v2 = vpack.i.bf16 %v378_v55, %v380_v60  ;;  %v1089_v3 = vpack.i.bf16 %v379_v62, %v389_v1  ;;  %v433_v1 = vsel %vm431_vm8, %v1058_v12, %v430_v7 }
 0x14f   : > { %v1109_v8 = vpack.i.bf16 %v1062_v23, %v433_v1 }
 0x150   : > { %1090 = vrot.lane.b32.xlu1 %v1089_v3, %s1350_s8  ;;  %1130 = vrot.lane.b32.xlu2 %v1129_v2, %s1350_s8 }
 0x151   : > { %1140 = vrot.lane.b32.xlu0 %v1139_v63, %s1350_s8 }
 0x158   : > { %1100 = vrot.lane.b32.xlu1 %v1099_v6, %s1350_s8  ;;  %462 = vperm.xlu2 %1144, %v459_v10  }
 0x159   : > { %697 = vrot.lane.b32.xlu0 %v1349_v0, %s1355_s14 }
 0x160   : > { %1110 = vrot.lane.b32.xlu1 %v1109_v8, %s1350_s8  ;;  %686 = vrot.lane.b32.xlu2 %v1532_v19, %s1358_s28  ;;  %v1086_v19 = vpop.permute.xlu0 %1085 }
 0x161   : > { %v1088_v36 = vunpack.i.h.bf16 %v1086_v19  ;;  %v1087_v37 = vunpack.i.l.bf16 %v1086_v19 }
 0x163   : > { %v530_v55 = vsel %vm362_vm2, %v1087_v37, %v1088_v36 }
 0x168   : > { %655 = vrot.lane.b32.xlu2 %v1594_v45, %s1361_s20  ;;  %1120 = vrot.lane.b32.xlu1 %v1119_v49, %s1350_s8  ;;  %v1081_v45 = vpop.permute.xlu2 %1080 }
 0x169   : > { %v1083_v11 = vunpack.i.h.bf16 %v1081_v45  ;;  %v1082_v20 = vunpack.i.l.bf16 %v1081_v45 }
 0x16b   : > { %v537_v34 = vsel %vm362_vm2, %v1082_v20, %v1083_v11 }
 0x170   : > { %472 = vrot.lane.b32.xlu1 %v306_v56, %s1350_s8 }
 0x178   : > { %708 = vrot.lane.b32.xlu1 %v1530_v17, %s1357_s18 }
 0x180   : > { %675 = vrot.lane.b32.xlu1 %v1538_v21, %s1359_s17 }
 0x19a   : > { %v1116_v16 = vpop.permute.xlu2 %1115 }
 0x19b   : > { %v1118_v41 = vunpack.i.h.bf16 %v1116_v16  ;;  %v1117_v42 = vunpack.i.l.bf16 %v1116_v16  ;;  %v458_v16 = vld [vmem:[%s1833_s1] sm:$0xf] }
 0x19d   : > { %v533_v57 = vsel %vm362_vm2, %v1117_v42, %v1118_v41 }
 0x1a2   : > { %v1126_v35 = vpop.permute.xlu2 %1125 }
 0x1a3   : > { %v1128_v58 = vunpack.i.h.bf16 %v1126_v35  ;;  %v1127_v59 = vunpack.i.l.bf16 %v1126_v35 }
 0x1aa   : > { %v1096_v4 = vpop.permute.xlu0 %1095  ;;  %v1131_v10 = vpop.permute.xlu2 %1130 }
 0x1ab   : > { %v1098_v50 = vunpack.i.h.bf16 %v1096_v4  ;;  %v1097_v51 = vunpack.i.l.bf16 %v1096_v4  ;;  %v1133_v56 = vunpack.i.h.bf16 %v1131_v10  ;;  %v1132_v19 = vunpack.i.l.bf16 %v1131_v10 }
 0x1ad   : > { %v538_v7 = vsel %vm362_vm2, %v1097_v51, %v1098_v50 }
 0x1ae   : > { %569 = vmatpush.msra.mxu0 %v538_v7 }
 0x1b2   : > { %v1106_v18 = vpop.permute.xlu0 %1105 }
 0x1b3   : > { %v1108_v23 = vunpack.i.h.bf16 %v1106_v18  ;;  %v1107_v25 = vunpack.i.l.bf16 %v1106_v18  ;;  %v525_v18 = vsel %vm362_vm2, %v1132_v19, %v1133_v56 }
 0x1b5   : > { %v534_v33 = vsel %vm362_vm2, %v1107_v25, %v1108_v23 }
 0x1ba   : > { %v1136_v38 = vpop.permute.xlu0 %1135 }
 0x1bb   : > { %v1138_v63 = vunpack.i.h.bf16 %v1136_v38  ;;  %v1137_v2 = vunpack.i.l.bf16 %v1136_v38 }
 0x1bd   : > { %v526_v4 = vsel %vm362_vm2, %v1137_v2, %v1138_v63 }
 0x1c2   : > { %v1091_v12 = vpop.permute.xlu1 %1090 }
 0x1c3   : > { %v1141_v62 = vpop.permute.xlu0 %1140  ;;  %v1093_v6 = vunpack.i.h.bf16 %v1091_v12  ;;  %v1092_v1 = vunpack.i.l.bf16 %v1091_v12 }
 0x1c4   : > { %v1143_v61 = vunpack.i.h.bf16 %v1141_v62  ;;  %v1142_v49 = vunpack.i.l.bf16 %v1141_v62 }
 0x1c5   : > { %v524_v51 = vsel %vm362_vm2, %v1093_v6, %v1132_v19  ;;  %v527_v7 = vsel %vm362_vm2, %v1138_v63, %v1092_v1 }
 0x1c6   : > { %v522_v45 = vsel %vm362_vm2, %v1142_v49, %v1143_v61 }
 0x1ca   : > { %v1101_v22 = vpop.permute.xlu1 %1100 }
 0x1cb   : > { %v1103_v17 = vunpack.i.h.bf16 %v1101_v22  ;;  %v1102_v30 = vunpack.i.l.bf16 %v1101_v22 }
 0x1cd   : > { %v536_v21 = vsel %vm362_vm2, %v1103_v17, %v1082_v20  ;;  %v539_v32 = vsel %vm362_vm2, %v1098_v50, %v1102_v30  ;;  %v529_v50 = vsel %vm362_vm2, %v1127_v59, %v1128_v58  ;;  %v463_v20 = vpop.permute.xlu2 %462 }
 0x1ce   : > { %570 = vmatpush.msra.mxu0 %v536_v21  ;;  %589 = vmatpush.msra.mxu1 %v539_v32 }
 0x1d0   : > { %571 = vmatpush.msra.mxu0 %v534_v33  ;;  %590 = vmatpush.msra.mxu1 %v537_v34 }
 0x1d2   : > { %v1111_v39 = vpop.permute.xlu1 %1110 }
 0x1d3   : > { %v1113_v43 = vunpack.i.h.bf16 %v1111_v39  ;;  %v1112_v46 = vunpack.i.l.bf16 %v1111_v39 }
 0x1d5   : > { %v532_v47 = vsel %vm362_vm2, %v1113_v43, %v1117_v42  ;;  %v535_v54 = vsel %vm362_vm2, %v1108_v23, %v1112_v46 }
 0x1d6   : > { %572 = vmatpush.msra.mxu0 %v532_v47  ;;  %591 = vmatpush.msra.mxu1 %v535_v54  ;;  %v698_v54 = vpop.permute.xlu0 %697 }
 0x1d8   : > { %573 = vmatpush.msra.mxu0 %v530_v55  ;;  %592 = vmatpush.msra.mxu1 %v533_v57 }
 0x1da   : > { %v1121_v60 = vpop.permute.xlu1 %1120 }
 0x1db   : > { %v1123_v3 = vunpack.i.h.bf16 %v1121_v60  ;;  %v1122_v5 = vunpack.i.l.bf16 %v1121_v60 }
 0x1dd   : > { %v528_v8 = vsel %vm362_vm2, %v1123_v3, %v1127_v59  ;;  %v531_v9 = vsel %vm362_vm2, %v1088_v36, %v1122_v5 }
 0x1de   : > { %574 = vmatpush.msra.mxu0 %v528_v8  ;;  %593 = vmatpush.msra.mxu1 %v531_v9 }
 0x1e0   : > { %575 = vmatpush.msra.mxu0 %v526_v4  ;;  %594 = vmatpush.msra.mxu1 %v529_v50 }
 0x1e2   : > { %v473_v12 = vpop.permute.xlu1 %472  ;;  %576 = vmatpush.msra.mxu0 %v524_v51  ;;  %595 = vmatpush.msra.mxu1 %v527_v7 }
 0x1e3   : > { %v523_v11 = vsel %vm362_vm2, %v1143_v61, %v473_v12 }
 0x1e4   : > { %577 = vmatpush.msra.mxu0 %v522_v45  ;;  %596 = vmatpush.msra.mxu1 %v525_v18 }
 0x1e5   : > { %968 = vmatmul.msk.f32.vlgmr.msra.gmra.mxu0 %vm558_vm12, %v458_v16 }
 0x1e6   : > { %597 = vmatpush.msra.mxu1 %v523_v11 }
 0x1e7   : > { %969 = vmatmul.msk.f32.vlgmr.msra.gmra.mxu1 %vm558_vm12, %v458_v16 }
 0x262   : > { %v579_v22 = vpop.f32.mrf.mxu0 }
 0x263   : > { %v580_v23 = vadd.f32 %v579_v22, %v463_v20 }
 0x264   : > { %v599_v25 = vpop.f32.mrf.mxu1 }
 0x265   : > { %v602_v17 = vmax.f32 %v580_v23, 0.0  ;;  %v600_v30 = vadd.f32 %v599_v25, %v463_v20 }
 0x267   : > { %604 = vst [vmem:[#allocation2 + $0x10] sm:$0xf] %v602_v17  ;;  %v603_v21 = vmax.f32 %v600_v30, 0.0 }
 0x269   : > { %605 = vst [vmem:[#allocation2 + $0x18] sm:$0xf] %v603_v21 }
 0x26e   : > { %v1699_v32 = vld [vmem:[#allocation2 + $0x10] sm:$0xff] }
 0x26f   : > { %v627_v34 = vmul.f32 %v1699_v32, %v1524_v13  ;;  %v624_v37 = vmul.f32 %v1699_v32, %v1526_v14  ;;  %v621_v14 = vmul.f32 %v1699_v32, %v1528_v15  ;;  %v687_v15 = vpop.permute.xlu2 %686  ;;  %v610_v17 = vmul.f32 %v1699_v32, %v1640_v53 }
 0x270   : > { %v1701_v33 = vld [vmem:[#allocation2 + $0x18] sm:$0xff] }
 0x271   : > { %v1145_v35 = vpack.i.bf16 %v1701_v33, %v1699_v32  ;;  %v628_v36 = vmul.f32 %v1701_v33, %v1560_v31  ;;  %v625_v38 = vmul.f32 %v1701_v33, %v1547_v26  ;;  %v622_v13 = vmul.f32 %v1701_v33, %v1577_v40 }
 0x272   : > { %v614_v31 = vmul.f32 %v1701_v33, %v1551_v28  ;;  %v613_v26 = vmul.f32 %v1699_v32, %v1554_v29  ;;  %v617_v40 = vmul.f32 %v1701_v33, %v1542_v24  ;;  %v616_v28 = vmul.f32 %v1699_v32, %v1589_v44  ;;  %v713_v32 = vld [vmem:[%s1836_s4] sm:$0xf] }
 0x273   : > { %1146 = vrot.lane.b32.xlu2 %v1145_v35, %s1355_s14  ;;  %v1155_v39 = vpack.i.bf16 %v628_v36, %v627_v34  ;;  %v1160_v41 = vpack.i.bf16 %v625_v38, %v624_v37  ;;  %v1165_v42 = vpack.i.bf16 %v622_v13, %v621_v14 }
 0x274   : > { %v1180_v43 = vpack.i.bf16 %v614_v31, %v613_v26  ;;  %v1170_v46 = vpack.i.bf16 %v617_v40, %v616_v28  ;;  %v611_v28 = vmul.f32 %v1701_v33, %v1634_v48 }
 0x275   : > { %1156 = vrot.lane.b32.xlu0 %v1155_v39, %s1357_s18  ;;  %1161 = vrot.lane.b32.xlu1 %v1160_v41, %s1358_s28  ;;  %s978_s18 = sshll.u32 %s1419_s25, 3  ;;  %s872_s25 = scalar_lea.sflag [#allocation5], %s1484_s11 }
 0x277   : > { %v656_v29 = vpop.permute.xlu2 %655 }
 0x27b   : > { %1151 = vrot.lane.b32.xlu2 %v1145_v35, %s1356_s15 }
 0x27d   : > { %1166 = vrot.lane.b32.xlu0 %v1165_v42, %s1359_s17  ;;  %1181 = vrot.lane.b32.xlu1 %v1180_v43, %s1360_s19 }
 0x283   : > { %633 = vrot.lane.b32.xlu2 %v1349_v0, %s1353_s13  ;;  %v709_v0 = vpop.permute.xlu1 %708 }
 0x285   : > { %1171 = vrot.lane.b32.xlu0 %v1170_v46, %s1361_s20  ;;  %644 = vrot.lane.b32.xlu1 %v1549_v27, %s1360_s19  ;;  %s883_s19 = scalar_lea.hbm %s1838_s6, %s978_s18  ;;  %s269_s20 = scalar_lea.vmem [#allocation6], %s965_s16 }
 0x286   : > { %s885_s26 = sshll.u32 %s269_s20, 4  ;;  %s887_s29 = sshll.u32 %s883_s19, 4  ;;  %s886_s26 = int_to_ptr.vmem [resolvable:$true] %s885_s26  ;;  %s888_s29 = int_to_ptr.hbm [resolvable:$true] %s887_s29 }
 0x287   : > { %s1295_s12 = sshra.s32 %s888_s29, 4  ;;  %s1301_s16 = scalar_lea.hbm %s1838_s6, 16  ;;  %s1296_s12 = int_to_ptr.hbm [resolvable:$true] %s1295_s12 }
 0x288   : > { %s1297_s7 = scalar_lea.hbm %s1296_s12, 8  ;;  %p1302_p0 = scmp.lt.s32.totalorder %s1296_s12, %s1838_s6 }
 0x289   : > { %p1298_p6 = scmp.ne.s32.totalorder %s1296_s12, %s1297_s7  ;;  %p1303_p1 = scmp.lt.s32.totalorder %s1301_s16, %s1297_s7 }
 0x28b   : > { %v676_v59 = vpop.permute.xlu1 %675  ;;  %p1299_p9 = pnand %p1298_p6, %p1448_p11  ;;  %p1304_p3 = por %p1303_p1, %p1302_p0 }
 0x28d   : > { %1176 = vrot.lane.b32.xlu0 %v1145_v35, %s1353_s13  ;;  %p1300_p13 = pneg %p1299_p9 }
 0x28f   : > { %p1305_p4 = pnand %p1304_p3, %p1300_p13 }
 0x2cd   : > { %v1147_v47 = vpop.permute.xlu2 %1146 }
 0x2ce   : > { %v1149_v55 = vunpack.i.h.bf16 %v1147_v47  ;;  %v1148_v24 = vunpack.i.l.bf16 %v1147_v47 }
 0x2d0   : > { %v699_v57 = vsel %vm443_vm6, %v1148_v24, %v1149_v55  ;;  %v700_v44 = vsel %vm443_vm6, %v1149_v55, %v698_v54 }
 0x2d1   : > { %v1185_v58 = vpack.i.bf16 %v700_v44, %v699_v57 }
 0x2d3   : > { %1186 = vrot.lane.b32.xlu1 %v1185_v58, %s1350_s8 }
 0x2d5   : > { %v1152_v60 = vpop.permute.xlu2 %1151 }
 0x2d6   : > { %v1154_v62 = vunpack.i.h.bf16 %v1152_v60  ;;  %v1153_v27 = vunpack.i.l.bf16 %v1152_v60 }
 0x2d8   : > { %v667_v5 = vsel %vm299_vm5, %v1153_v27, %v1154_v62 }
 0x2dd   : > { %v634_v42 = vpop.permute.xlu2 %633 }
 0x2e7   : > { %v1157_v63 = vpop.permute.xlu0 %1156  ;;  %v1162_v2 = vpop.permute.xlu1 %1161 }
 0x2e8   : > { %v1163_v3 = vunpack.i.l.bf16 %v1162_v2  ;;  %v1164_v6 = vunpack.i.h.bf16 %v1162_v2  ;;  %v1158_v1 = vunpack.i.l.bf16 %v1157_v63  ;;  %v1159_v4 = vunpack.i.h.bf16 %v1157_v63 }
 0x2ea   : > { %v1195_v10 = vpack.i.bf16 %v667_v5, %v1163_v3  ;;  %v688_v9 = vsel %vm431_vm8, %v1163_v3, %v1164_v6  ;;  %v710_v45 = vsel %vm455_vm7, %v1158_v1, %v1159_v4  ;;  %v711_v12 = vsel %vm455_vm7, %v1159_v4, %v709_v0 }
 0x2eb   : > { %v1210_v19 = vpack.i.bf16 %v688_v9, %v1158_v1  ;;  %v1205_v18 = vpack.i.bf16 %v711_v12, %v710_v45  ;;  %v689_v25 = vsel %vm431_vm8, %v1164_v6, %v687_v15 }
 0x2ec   : > { %1196 = vrot.lane.b32.xlu2 %v1195_v10, %s1350_s8  ;;  %v1215_v36 = vpack.i.bf16 %v1148_v24, %v689_v25 }
 0x2ef   : > { %v1167_v8 = vpop.permute.xlu0 %1166  ;;  %v1182_v49 = vpop.permute.xlu1 %1181 }
 0x2f0   : > { %v1168_v61 = vunpack.i.l.bf16 %v1167_v8  ;;  %v1184_v50 = vunpack.i.h.bf16 %v1182_v49  ;;  %v1183_v51 = vunpack.i.l.bf16 %v1182_v49  ;;  %v1169_v39 = vunpack.i.h.bf16 %v1167_v8 }
 0x2f2   : > { %v1200_v56 = vpack.i.bf16 %v1168_v61, %v1154_v62  ;;  %v651_v16 = vsel %vm390_vm10, %v1183_v51, %v1184_v50  ;;  %v677_v13 = vsel %vm419_vm9, %v1168_v61, %v1169_v39  ;;  %v678_v53 = vsel %vm419_vm9, %v1169_v39, %v676_v59 }
 0x2f3   : > { %v1230_v11 = vpack.i.bf16 %v651_v16, %v1153_v27  ;;  %v1220_v14 = vpack.i.bf16 %v678_v53, %v677_v13 }
 0x2f4   : > { %1211 = vrot.lane.b32.xlu2 %v1210_v19, %s1350_s8  ;;  %1201 = vrot.lane.b32.xlu0 %v1200_v56, %s1350_s8 }
 0x2f7   : > { %v1172_v7 = vpop.permute.xlu0 %1171  ;;  %v645_v20 = vpop.permute.xlu1 %644 }
 0x2f8   : > { %v650_v22 = vsel %vm390_vm10, %v645_v20, %v1183_v51  ;;  %v1173_v37 = vunpack.i.l.bf16 %v1172_v7  ;;  %v1174_v26 = vunpack.i.h.bf16 %v1172_v7 }
 0x2f9   : > { %v1240_v34 = vpack.i.bf16 %v610_v17, %v650_v22 }
 0x2fa   : > { %v661_v41 = vsel %vm402_vm11, %v656_v29, %v1173_v37  ;;  %v662_v40 = vsel %vm402_vm11, %v1173_v37, %v1174_v26 }
 0x2fb   : > { %v1235_v31 = vpack.i.bf16 %v661_v41, %v1184_v50  ;;  %v1225_v15 = vpack.i.bf16 %v1174_v26, %v662_v40 }
 0x2fc   : > { %1206 = vrot.lane.b32.xlu0 %v1205_v18, %s1350_s8  ;;  %1231 = vrot.lane.b32.xlu2 %v1230_v11, %s1350_s8 }
 0x2ff   : > { %v1177_v23 = vpop.permute.xlu0 %1176 }
 0x300   : > { %v1179_v30 = vunpack.i.h.bf16 %v1177_v23  ;;  %v1178_v21 = vunpack.i.l.bf16 %v1177_v23 }
 0x302   : > { %v640_v35 = vsel %vm323_vm4, %v1178_v21, %v1179_v30  ;;  %v639_v43 = vsel %vm323_vm4, %v634_v42, %v1178_v21 }
 0x303   : > { %v1190_v38 = vpack.i.bf16 %v1179_v30, %v640_v35  ;;  %v1245_v46 = vpack.i.bf16 %v639_v43, %v611_v28 }
 0x304   : > { %1216 = vrot.lane.b32.xlu0 %v1215_v36, %s1350_s8  ;;  %1241 = vrot.lane.b32.xlu2 %v1240_v34, %s1350_s8 }
 0x305   : > { %1191 = vrot.lane.b32.xlu1 %v1190_v38, %s1350_s8 }
 0x30c   : > { %1236 = vrot.lane.b32.xlu0 %v1235_v31, %s1350_s8  ;;  %716 = vperm.xlu2 %1144, %v713_v32  }
 0x30d   : > { %1221 = vrot.lane.b32.xlu1 %v1220_v14, %s1350_s8  ;;  %v712_v14 = vld [vmem:[%s1835_s3] sm:$0xf] }
 0x314   : > { %1246 = vrot.lane.b32.xlu0 %v1245_v46, %s1350_s8  ;;  %v859_v46 = vld.sshfl [vmem:[#allocation1 + $0x8] sm:$0xff pattern:$0x75316420] }
 0x315   : > { %1226 = vrot.lane.b32.xlu1 %v1225_v15, %s1350_s8 }
 0x31d   : > { %722 = vrot.lane.b32.xlu1 %v1636_v52, %s1350_s8 }
 0x345   : > { %v1187_v54 = vpop.permute.xlu1 %1186 }
 0x346   : > { %v1197_v29 = vpop.permute.xlu2 %1196  ;;  %v1189_v24 = vunpack.i.h.bf16 %v1187_v54  ;;  %v1188_v44 = vunpack.i.l.bf16 %v1187_v54 }
 0x347   : > { %v1198_v3 = vunpack.i.l.bf16 %v1197_v29  ;;  %v1199_v50 = vunpack.i.h.bf16 %v1197_v29 }
 0x348   : > { %v791_v60 = vsel %vm362_vm2, %v1188_v44, %v1189_v24 }
 0x34e   : > { %v1212_v55 = vpop.permute.xlu2 %1211 }
 0x34f   : > { %v1213_v58 = vunpack.i.l.bf16 %v1212_v55  ;;  %v1214_v62 = vunpack.i.h.bf16 %v1212_v55 }
 0x351   : > { %v788_v1 = vsel %vm362_vm2, %v1198_v3, %v1214_v62 }
 0x356   : > { %v1232_v6 = vpop.permute.xlu2 %1231 }
 0x357   : > { %v1233_v9 = vunpack.i.l.bf16 %v1232_v6  ;;  %v1234_v30 = vunpack.i.h.bf16 %v1232_v6 }
 0x359   : > { %v784_v12 = vsel %vm362_vm2, %v1233_v9, %v1199_v50 }
 0x35e   : > { %v1242_v45 = vpop.permute.xlu2 %1241 }
 0x35f   : > { %v1243_v18 = vunpack.i.l.bf16 %v1242_v45  ;;  %v1244_v13 = vunpack.i.h.bf16 %v1242_v45 }
 0x361   : > { %v780_v39 = vsel %vm362_vm2, %v1243_v18, %v1234_v30 }
 0x366   : > { %v1202_v47 = vpop.permute.xlu0 %1201  ;;  %v717_v43 = vpop.permute.xlu2 %716 }
 0x367   : > { %v1204_v49 = vunpack.i.h.bf16 %v1202_v47  ;;  %v1203_v56 = vunpack.i.l.bf16 %v1202_v47  ;;  %v858_v47 = vld.sshfl [vmem:[#allocation1] sm:$0xff pattern:$0x75316420] }
 0x369   : > { %v785_v16 = vsel %vm362_vm2, %v1199_v50, %v1203_v56 }
 0x36e   : > { %v1207_v57 = vpop.permute.xlu0 %1206 }
 0x36f   : > { %v1209_v0 = vunpack.i.h.bf16 %v1207_v57  ;;  %v1208_v59 = vunpack.i.l.bf16 %v1207_v57 }
 0x371   : > { %v792_v48 = vsel %vm362_vm2, %v1213_v58, %v1208_v59  ;;  %v793_v33 = vsel %vm362_vm2, %v1208_v59, %v1209_v0 }
 0x372   : > { %822 = vmatpush.msra.mxu2 %v792_v48  ;;  %842 = vmatpush.msra.mxu3 %v793_v33 }
 0x374   : > { %843 = vmatpush.msra.mxu3 %v791_v60 }
 0x376   : > { %v1217_v52 = vpop.permute.xlu0 %1216 }
 0x377   : > { %v1219_v27 = vunpack.i.h.bf16 %v1217_v52  ;;  %v1218_v63 = vunpack.i.l.bf16 %v1217_v52  ;;  %v1192_v2 = vpop.permute.xlu1 %1191 }
 0x378   : > { %v1194_v21 = vunpack.i.h.bf16 %v1192_v2  ;;  %v1193_v34 = vunpack.i.l.bf16 %v1192_v2 }
 0x379   : > { %v790_v5 = vsel %vm362_vm2, %v1219_v27, %v1188_v44  ;;  %v789_v10 = vsel %vm362_vm2, %v1214_v62, %v1218_v63 }
 0x37a   : > { %823 = vmatpush.msra.mxu2 %v790_v5  ;;  %844 = vmatpush.msra.mxu3 %v789_v10  ;;  %v779_v32 = vsel %vm362_vm2, %v1193_v34, %v1194_v21 }
 0x37c   : > { %824 = vmatpush.msra.mxu2 %v788_v1 }
 0x37e   : > { %v1237_v8 = vpop.permute.xlu0 %1236 }
 0x37f   : > { %v1222_v61 = vpop.permute.xlu1 %1221  ;;  %v1239_v22 = vunpack.i.h.bf16 %v1237_v8  ;;  %v1238_v23 = vunpack.i.l.bf16 %v1237_v8 }
 0x380   : > { %v1224_v19 = vunpack.i.h.bf16 %v1222_v61  ;;  %v1223_v4 = vunpack.i.l.bf16 %v1222_v61 }
 0x381   : > { %v781_v41 = vsel %vm362_vm2, %v1234_v30, %v1238_v23 }
 0x382   : > { %v786_v51 = vsel %vm362_vm2, %v1204_v49, %v1223_v4  ;;  %v787_v7 = vsel %vm362_vm2, %v1223_v4, %v1224_v19 }
 0x383   : > { %825 = vmatpush.msra.mxu2 %v786_v51  ;;  %845 = vmatpush.msra.mxu3 %v787_v7 }
 0x385   : > { %826 = vmatpush.msra.mxu2 %v784_v12  ;;  %846 = vmatpush.msra.mxu3 %v785_v16 }
 0x386   : > { %v1247_v11 = vpop.permute.xlu0 %1246 }
 0x387   : > { %v1227_v20 = vpop.permute.xlu1 %1226  ;;  %v1249_v35 = vunpack.i.h.bf16 %v1247_v11  ;;  %v1248_v38 = vunpack.i.l.bf16 %v1247_v11 }
 0x388   : > { %v1229_v25 = vunpack.i.h.bf16 %v1227_v20  ;;  %v1228_v17 = vunpack.i.l.bf16 %v1227_v20 }
 0x389   : > { %v778_v53 = vsel %vm362_vm2, %v1249_v35, %v1193_v34  ;;  %v777_v42 = vsel %vm362_vm2, %v1244_v13, %v1248_v38 }
 0x38a   : > { %v782_v36 = vsel %vm362_vm2, %v1239_v22, %v1228_v17  ;;  %v783_v37 = vsel %vm362_vm2, %v1228_v17, %v1229_v25 }
 0x38b   : > { %827 = vmatpush.msra.mxu2 %v782_v36  ;;  %847 = vmatpush.msra.mxu3 %v783_v37 }
 0x38d   : > { %828 = vmatpush.msra.mxu2 %v780_v39  ;;  %848 = vmatpush.msra.mxu3 %v781_v41 }
 0x38f   : > { %v723_v31 = vpop.permute.xlu1 %722  ;;  %829 = vmatpush.msra.mxu2 %v778_v53  ;;  %849 = vmatpush.msra.mxu3 %v779_v32 }
 0x390   : > { %v776_v26 = vsel %vm362_vm2, %v723_v31, %v1244_v13 }
 0x391   : > { %830 = vmatpush.msra.mxu2 %v776_v26  ;;  %850 = vmatpush.msra.mxu3 %v777_v42 }
 0x392   : > { %970 = vmatmul.msk.f32.vlgmr.msra.gmra.mxu2 %vm558_vm12, %v712_v14  ;;  %971 = vmatmul.msk.f32.vlgmr.msra.gmra.mxu3 %vm558_vm12, %v712_v14 }
 0x415   : > { %v832_v40 = vpop.f32.mrf.mxu2  ;;  %v852_v28 = vpop.f32.mrf.mxu3 }
 0x416   : > { %v833_v15 = vadd.f32 %v832_v40, %v717_v43  ;;  %v853_v29 = vadd.f32 %v852_v28, %v717_v43 }
 0x418   : > { %v863_v54 = vadd.f32 %v859_v46, %v853_v29  ;;  %v862_v55 = vadd.f32 %v858_v47, %v833_v15 }
 0x41a   : > { %v866_v24 = vrot.slane %v863_v54, 4 }
 0x41c   : > { %v868_v57 = vsel %vm867_vm13, %v862_v55, %v866_v24 }
 0x41d   : > { %870 = vst [vmem:[%s269_s20] sm:$0xff] %v868_v57 }
 0x41e   : > { %1308 = shalt.err (!%p1305_p4)
}
 0x41f   : > { %981 = dma.vmem_to_hbm [thread:$0]  (%p1448_p11), %s886_s26, 128, %s888_s29, %s872_s25  }
 0x420 PF: > { %s899_s11 = sand.u32 1, %s1335_s21   ;;  %p1844_p7 = scmp.ge.s32.totalorder %s1347_s24, 2 }
 0x421   : > { %s900_s18 = scalar_lea.sflag [#allocation5], %s899_s11 }
 0x422   : > { %p988_p5 = pnand %p1844_p7, %p1452_p12 }
 0x424   : > { %p989_p8 = pneg %p988_p5 }
 0x426   : > { %1330 = dma.done.wait (%p989_p8), %s900_s18, 128  }
 0x427   : > { %1332 = vsyncadd (%p989_p8), %s900_s18, 4294967168  ;;  %p19_p10 = scmp.ge.s32.totalorder %s1423_s27, 4   ;;  %s1845_s21 = smov %s1339_s22 }
 0x428   : > { %s1846_s22 = smov %s1343_s23  ;;  %s1847_s23 = smov %s1435_s30 }
 0x429   : > { %s1848_s24 = smov %s1423_s27  ;;  %21 = sbr.rel (!%p19_p10) target bundleno = 5 (0x5), region = 90 }
 0x42e   :  { %906 = vsyncpa [#allocation4], 1 }
 0x42f   :  { %908 = vsyncpa [#allocation4 + $0x1], 1 }
 0x430   :  { %909 = vsyncpa [#allocation5], 1 }
 0x431   :  { %911 = vsyncpa [#allocation5 + $0x1], 1 }

</bundles_post_ra>
